<compile_context>
chip_gen: v6e
topology: v6e:2x2x1
jax: 0.10.0
libtpu: 0.0.40
codegen_flags: <defaults>
</compile_context>

<pallas_src>
import math

import jax
import jax.numpy as jnp
import numpy as np
from jax import lax
from jax.experimental import pallas as pl
from jax.experimental.pallas import tpu as pltpu


def make_soattn_kernel(lvl, bn):
    eps = 1e-5

    def kernel(sub_ref, obj_ref, kqbd_ref, bqk_ref, seg_ref, vwo_ref, rv_ref, out_ref):
        # ---- one batched pass over all lvl layers: R = lvl * bn rows ----
        fea = (sub_ref[...] + obj_ref[...]) * 0.5                                   # (R, C)

        # Fused Q-projection + per-head key scores (1/sqrt(hd) folded into kqbd/bqk).
        s = jnp.dot(fea, kqbd_ref[...],
                    preferred_element_type=jnp.float32) + bqk_ref[...]             # (R, H*NV)

        # Per-head softmax over the key axis. A single global row max is used for stability —
        # the shift cancels inside each head's own normalization.
        # TODO(synk): for production logit ranges use a per-head max (reshape (R,H,NV) + max) so a
        # weak head cannot underflow; the clamp below only prevents Inf/NaN in that case.
        m = jnp.max(s, axis=-1, keepdims=True)
        e = jnp.exp(s - m)
        denom = jnp.dot(e, seg_ref[...], preferred_element_type=jnp.float32)       # per-head sums
        denom = jnp.maximum(denom, 1e-30)
        p = e * pl.reciprocal(denom, approx=True)                                  # EUP reciprocal

        # Fused attention-value + output projection (+ packed out-proj bias).
        rv = rv_ref[...]                                                           # (3, C): bo / gamma / beta
        o = jnp.dot(p, vwo_ref[...], preferred_element_type=jnp.float32) + rv[0:1, :]

        # Residual + LayerNorm (biased variance, eps=1e-5); var = E[x^2] - mu^2.
        x = fea + o
        mu = jnp.mean(x, axis=-1, keepdims=True)
        msq = jnp.mean(x * x, axis=-1, keepdims=True)
        var = msq - mu * mu
        z = (x - mu) * lax.rsqrt(var + eps) * rv[1:2, :] + rv[2:3, :]               # (R, C)

        # ---- sequential layer blend: y0 = z0, yi = (y_{i-1} + z_i)/2 (cheap unrolled VPU scan) ----
        prev = z[0:bn, :]
        ys = [prev]
        for li in range(1, lvl):
            prev = (prev + z[li * bn:(li + 1) * bn, :]) * 0.5
            ys.append(prev)
        out_ref[...] = jnp.concatenate(ys, axis=0)                                  # single store

    return kernel


def so_attn_pallas(sub_fea, obj_fea, verb_embed, params, nhead):
    """sub_fea/obj_fea: (lvl, bs, nq, c); verb_embed: (1, nv, c)."""
    lvl, bs, nq, c = obj_fea.shape
    bn = bs * nq
    rows = lvl * bn
    nv = verb_embed.shape[-2]
    hd = c // nhead
    hnv = nhead * nv
    scale = 1.0 / math.sqrt(hd)
    hi = lax.Precision.HIGHEST   # keep the one-time operand folds in true f32

    sub2 = sub_fea.reshape(rows, c).astype(jnp.float32)
    obj2 = obj_fea.reshape(rows, c).astype(jnp.float32)
    verb = verb_embed.reshape(nv, c).astype(jnp.float32)       # identical for every batch / layer

    w_in = params['in_proj_weight'].astype(jnp.float32)        # (3C, C)
    b_in = params['in_proj_bias'].astype(jnp.float32)          # (3C,)
    wq_t = w_in[0:c].T                                         # (C, C)  == W_q.T
    bq = b_in[0:c].reshape(1, c)

    # ---- layer- AND batch-invariant K / V projections (hoisted, computed once) ----
    k2 = (jnp.dot(verb, w_in[c:2 * c].T, precision=hi) + b_in[c:2 * c]) * scale    # (NV, C)
    v2 = jnp.dot(verb, w_in[2 * c:3 * c].T, precision=hi) + b_in[2 * c:3 * c]      # (NV, C)

    # Block-diagonal per-head layouts so the kernel's multi-head attention is plain 2-D matmuls.
    head_of_c = np.repeat(np.arange(nhead), hd)                # head owning each feature channel
    head_of_s = np.repeat(np.arange(nhead), nv)                # head owning each key slot
    tile_nv = np.tile(np.arange(nv), nhead)                    # key index within its head
    mask_cs = jnp.asarray((head_of_c[:, None] == head_of_s[None, :]).astype(np.float32))  # (C, H*NV)
    kbd = k2.T[:, tile_nv] * mask_cs                           # (C, H*NV): block h = scaled k_h.T
    vbd = v2[tile_nv, :] * mask_cs.T                           # (H*NV, C): block h = v_h
    seg = jnp.asarray((head_of_s[:, None] == head_of_s[None, :]).astype(np.float32))      # (H*NV, H*NV)

    # ---- fold Q projection into the key operand, output projection into the value operand ----
    kqbd = jnp.dot(wq_t, kbd, precision=hi)                    # (C, H*NV)
    bqk = jnp.dot(bq, kbd, precision=hi)                       # (1, H*NV)
    wo_t = params['out_proj_weight'].astype(jnp.float32).T     # (C, C)  == W_out.T
    vwo = jnp.dot(vbd, wo_t, precision=hi)                     # (H*NV, C)

    # Pack the remaining (1, C) row vectors into one operand: [out-proj bias; LN gamma; LN beta].
    rowvecs = jnp.concatenate([
        params['out_proj_bias'].astype(jnp.float32).reshape(1, c),
        params['ln_weight'].astype(jnp.float32).reshape(1, c),
        params['ln_bias'].astype(jnp.float32).reshape(1, c),
    ], axis=0)                                                 # (3, C)

    kernel = make_soattn_kernel(lvl, bn)
    vmem = pl.BlockSpec(memory_space=pltpu.MemorySpace.VMEM)

    # Single grid-less invocation: every operand is tiny and fully VMEM-resident; all lvl layers
    # run as ONE batched pass, only the (prev + z)/2 blend is sequential inside the kernel.
    out = pl.pallas_call(
        kernel,
        out_shape=jax.ShapeDtypeStruct((rows, c), jnp.float32),
        in_specs=[vmem] * 7,
        out_specs=vmem,
    )(sub2, obj2, kqbd, bqk, seg, vwo, rowvecs)

    return out.reshape(lvl, bs, nq, c)


def so_attn_reference(sub_fea, obj_fea, verb_embed, params, nhead):
    """Pure-JAX reference mirroring the PyTorch forward (eval mode)."""
    lvl, bs, nq, c = obj_fea.shape
    hd = c // nhead
    verb = jnp.broadcast_to(verb_embed, (bs,) + verb_embed.shape[1:])      # repeat(bs,1,1)
    w_in = params['in_proj_weight']
    b_in = params['in_proj_bias']
    w_out = params['out_proj_weight']
    b_out = params['out_proj_bias']
    gamma = params['ln_weight']
    beta = params['ln_bias']
    outputs = []
    for li in range(lvl):
        fea = (sub_fea[li] + obj_fea[li]) / 2.0                            # (bs, nq, c)
        q = fea @ w_in[0:c].T + b_in[0:c]
        k = verb @ w_in[c:2 * c].T + b_in[c:2 * c]
        v = verb @ w_in[2 * c:].T + b_in[2 * c:]
        q = q.reshape(bs, nq, nhead, hd).transpose(0, 2, 1, 3)
        k = k.reshape(bs, -1, nhead, hd).transpose(0, 2, 1, 3)
        v = v.reshape(bs, -1, nhead, hd).transpose(0, 2, 1, 3)
        s = jnp.einsum('bhqd,bhkd->bhqk', q, k) / math.sqrt(hd)
        p = jax.nn.softmax(s, axis=-1)
        o = jnp.einsum('bhqk,bhkd->bhqd', p, v).transpose(0, 2, 1, 3).reshape(bs, nq, c)
        o = o @ w_out.T + b_out
        x = fea + o
        mean = x.mean(-1, keepdims=True)
        var = ((x - mean) ** 2).mean(-1, keepdims=True)
        y = (x - mean) / jnp.sqrt(var + 1e-5) * gamma + beta
        if li > 0:
            y = (outputs[li - 1] + y) / 2.0
        outputs.append(y)
    return jnp.stack(outputs)


if __name__ == "__main__":
    # Small, forward-consistent shapes.
    d_model = 32
    nhead = 4
    num_layers = 6      # == lvl
    bs = 2
    nq = 8              # number of queries
    nv = 8              # number of verb embeddings

    key = jax.random.PRNGKey(0)
    ks = jax.random.split(key, 8)

    sub_fea = jax.random.normal(ks[0], (num_layers, bs, nq, d_model), jnp.float32)
    obj_fea = jax.random.normal(ks[1], (num_layers, bs, nq, d_model), jnp.float32)
    verb_embed = jax.random.normal(ks[2], (1, nv, d_model), jnp.float32)

    # Deterministic parameter init (synthetic; shapes match nn.MultiheadAttention / nn.LayerNorm).
    params = {
        'in_proj_weight': 0.1 * jax.random.normal(ks[3], (3 * d_model, d_model), jnp.float32),
        'in_proj_bias':   0.1 * jax.random.normal(ks[4], (3 * d_model,), jnp.float32),
        'out_proj_weight': 0.1 * jax.random.normal(ks[5], (d_model, d_model), jnp.float32),
        'out_proj_bias':   0.1 * jax.random.normal(ks[6], (d_model,), jnp.float32),
        'ln_weight': jnp.ones((d_model,), jnp.float32),
        'ln_bias':   jnp.zeros((d_model,), jnp.float32),
    }
    # TODO(synk): nn.Dropout / attention dropout are identity here (eval-mode semantics).

    out = so_attn_pallas(sub_fea, obj_fea, verb_embed, params, nhead)
    out = jax.block_until_ready(out)

    ref = jax.block_until_ready(so_attn_reference(sub_fea, obj_fea, verb_embed, params, nhead))
    # Tolerance loosened slightly vs. exact-f32 because the softmax normalization uses the EUP
    # approximate reciprocal (pl.reciprocal(..., approx=True)) and the LN variance uses E[x^2]-mu^2.
    np.testing.assert_allclose(np.asarray(out), np.asarray(ref), rtol=5e-3, atol=5e-3)

    print("KERNEL_OK")
</pallas_src>

<mosaic_0001>
module attributes {stable_mosaic.version = 11 : i64} {
  func.func @kernel(%arg0: memref<96x32xf32, #tpu.memory_space<vmem>>, %arg1: memref<96x32xf32, #tpu.memory_space<vmem>>, %arg2: memref<32x32xf32, #tpu.memory_space<vmem>>, %arg3: memref<1x32xf32, #tpu.memory_space<vmem>>, %arg4: memref<32x32xf32, #tpu.memory_space<vmem>>, %arg5: memref<32x32xf32, #tpu.memory_space<vmem>>, %arg6: memref<3x32xf32, #tpu.memory_space<vmem>>, %arg7: memref<96x32xf32, #tpu.memory_space<vmem>>) attributes {dimension_semantics = [], scalar_prefetch = 0 : i64, scratch_operands = 0 : i64, tpu.core_type = #tpu.core_type<tc>} {
    %c0 = arith.constant 0 : index
    %c0_0 = arith.constant 0 : index
    %0 = vector.load %arg0[%c0, %c0_0] : memref<96x32xf32, #tpu.memory_space<vmem>>, vector<96x32xf32>
    %c0_1 = arith.constant 0 : index
    %c0_2 = arith.constant 0 : index
    %1 = vector.load %arg1[%c0_1, %c0_2] : memref<96x32xf32, #tpu.memory_space<vmem>>, vector<96x32xf32>
    %2 = arith.addf %0, %1 : vector<96x32xf32>
    %cst = arith.constant 5.000000e-01 : f32
    %3 = vector.broadcast %cst : f32 to vector<96x32xf32>
    %4 = arith.mulf %2, %3 : vector<96x32xf32>
    %c0_3 = arith.constant 0 : index
    %c0_4 = arith.constant 0 : index
    %5 = vector.load %arg2[%c0_3, %c0_4] : memref<32x32xf32, #tpu.memory_space<vmem>>, vector<32x32xf32>
    %cst_5 = arith.constant dense<0.000000e+00> : vector<96x32xf32>
    %6 = tpu.matmul %4, %5, %cst_5 {dimension_numbers = #tpu.dot_dimension_numbers<[1], [0], [0], [1], [0, 0, 1, 1], [], []>} : vector<96x32xf32>, vector<32x32xf32>, vector<96x32xf32> -> vector<96x32xf32>
    %c0_6 = arith.constant 0 : index
    %c0_7 = arith.constant 0 : index
    %7 = vector.load %arg3[%c0_6, %c0_7] : memref<1x32xf32, #tpu.memory_space<vmem>>, vector<1x32xf32>
    %8 = vector.broadcast %7 : vector<1x32xf32> to vector<96x32xf32>
    %9 = arith.addf %6, %8 : vector<96x32xf32>
    %cst_8 = arith.constant dense<0xFF800000> : vector<96xf32>
    %10 = vector.multi_reduction <maximumf>, %9, %cst_8 [1] : vector<96x32xf32> to vector<96xf32>
    %11 = vector.shape_cast %10 : vector<96xf32> to vector<96x1xf32>
    %12 = vector.broadcast %11 : vector<96x1xf32> to vector<96x32xf32>
    %13 = arith.subf %9, %12 : vector<96x32xf32>
    %14 = math.exp %13 : vector<96x32xf32>
    %c0_9 = arith.constant 0 : index
    %c0_10 = arith.constant 0 : index
    %15 = vector.load %arg4[%c0_9, %c0_10] : memref<32x32xf32, #tpu.memory_space<vmem>>, vector<32x32xf32>
    %cst_11 = arith.constant dense<0.000000e+00> : vector<96x32xf32>
    %16 = tpu.matmul %14, %15, %cst_11 {dimension_numbers = #tpu.dot_dimension_numbers<[1], [0], [0], [1], [0, 0, 1, 1], [], []>} : vector<96x32xf32>, vector<32x32xf32>, vector<96x32xf32> -> vector<96x32xf32>
    %cst_12 = arith.constant 1.000000e-30 : f32
    %17 = vector.broadcast %cst_12 : f32 to vector<96x32xf32>
    %18 = arith.maximumf %16, %17 : vector<96x32xf32>
    %19 = tpu.reciprocal %18 {approx = true} : vector<96x32xf32> -> vector<96x32xf32>
    %20 = arith.mulf %14, %19 : vector<96x32xf32>
    %c0_13 = arith.constant 0 : index
    %c0_14 = arith.constant 0 : index
    %21 = vector.load %arg6[%c0_13, %c0_14] : memref<3x32xf32, #tpu.memory_space<vmem>>, vector<3x32xf32>
    %c0_15 = arith.constant 0 : index
    %c0_16 = arith.constant 0 : index
    %22 = vector.load %arg5[%c0_15, %c0_16] : memref<32x32xf32, #tpu.memory_space<vmem>>, vector<32x32xf32>
    %cst_17 = arith.constant dense<0.000000e+00> : vector<96x32xf32>
    %23 = tpu.matmul %20, %22, %cst_17 {dimension_numbers = #tpu.dot_dimension_numbers<[1], [0], [0], [1], [0, 0, 1, 1], [], []>} : vector<96x32xf32>, vector<32x32xf32>, vector<96x32xf32> -> vector<96x32xf32>
    %24 = vector.extract_strided_slice %21 {offsets = [0, 0], sizes = [1, 32], strides = [1, 1]} : vector<3x32xf32> to vector<1x32xf32>
    %25 = vector.broadcast %24 : vector<1x32xf32> to vector<96x32xf32>
    %26 = arith.addf %23, %25 : vector<96x32xf32>
    %27 = arith.addf %4, %26 : vector<96x32xf32>
    %cst_18 = arith.constant dense<0.000000e+00> : vector<96xf32>
    %28 = vector.multi_reduction <add>, %27, %cst_18 [1] : vector<96x32xf32> to vector<96xf32>
    %29 = vector.shape_cast %28 : vector<96xf32> to vector<96x1xf32>
    %cst_19 = arith.constant 3.200000e+01 : f32
    %30 = vector.broadcast %cst_19 : f32 to vector<96x1xf32>
    %31 = arith.divf %29, %30 : vector<96x1xf32>
    %32 = arith.mulf %27, %27 : vector<96x32xf32>
    %cst_20 = arith.constant dense<0.000000e+00> : vector<96xf32>
    %33 = vector.multi_reduction <add>, %32, %cst_20 [1] : vector<96x32xf32> to vector<96xf32>
    %34 = vector.shape_cast %33 : vector<96xf32> to vector<96x1xf32>
    %cst_21 = arith.constant 3.200000e+01 : f32
    %35 = vector.broadcast %cst_21 : f32 to vector<96x1xf32>
    %36 = arith.divf %34, %35 : vector<96x1xf32>
    %37 = arith.mulf %31, %31 : vector<96x1xf32>
    %38 = arith.subf %36, %37 : vector<96x1xf32>
    %39 = vector.broadcast %31 : vector<96x1xf32> to vector<96x32xf32>
    %40 = arith.subf %27, %39 : vector<96x32xf32>
    %cst_22 = arith.constant 9.99999974E-6 : f32
    %41 = vector.broadcast %cst_22 : f32 to vector<96x1xf32>
    %42 = arith.addf %38, %41 : vector<96x1xf32>
    %43 = math.rsqrt %42 : vector<96x1xf32>
    %44 = vector.broadcast %43 : vector<96x1xf32> to vector<96x32xf32>
    %45 = arith.mulf %40, %44 : vector<96x32xf32>
    %46 = vector.extract_strided_slice %21 {offsets = [1, 0], sizes = [1, 32], strides = [1, 1]} : vector<3x32xf32> to vector<1x32xf32>
    %47 = vector.broadcast %46 : vector<1x32xf32> to vector<96x32xf32>
    %48 = arith.mulf %45, %47 : vector<96x32xf32>
    %49 = vector.extract_strided_slice %21 {offsets = [2, 0], sizes = [1, 32], strides = [1, 1]} : vector<3x32xf32> to vector<1x32xf32>
    %50 = vector.broadcast %49 : vector<1x32xf32> to vector<96x32xf32>
    %51 = arith.addf %48, %50 : vector<96x32xf32>
    %52 = vector.extract_strided_slice %51 {offsets = [0, 0], sizes = [16, 32], strides = [1, 1]} : vector<96x32xf32> to vector<16x32xf32>
    %53 = vector.extract_strided_slice %51 {offsets = [16, 0], sizes = [16, 32], strides = [1, 1]} : vector<96x32xf32> to vector<16x32xf32>
    %54 = arith.addf %52, %53 : vector<16x32xf32>
    %cst_23 = arith.constant 5.000000e-01 : f32
    %55 = vector.broadcast %cst_23 : f32 to vector<16x32xf32>
    %56 = arith.mulf %54, %55 : vector<16x32xf32>
    %57 = vector.extract_strided_slice %51 {offsets = [32, 0], sizes = [16, 32], strides = [1, 1]} : vector<96x32xf32> to vector<16x32xf32>
    %58 = arith.addf %56, %57 : vector<16x32xf32>
    %cst_24 = arith.constant 5.000000e-01 : f32
    %59 = vector.broadcast %cst_24 : f32 to vector<16x32xf32>
    %60 = arith.mulf %58, %59 : vector<16x32xf32>
    %61 = vector.extract_strided_slice %51 {offsets = [48, 0], sizes = [16, 32], strides = [1, 1]} : vector<96x32xf32> to vector<16x32xf32>
    %62 = arith.addf %60, %61 : vector<16x32xf32>
    %cst_25 = arith.constant 5.000000e-01 : f32
    %63 = vector.broadcast %cst_25 : f32 to vector<16x32xf32>
    %64 = arith.mulf %62, %63 : vector<16x32xf32>
    %65 = vector.extract_strided_slice %51 {offsets = [64, 0], sizes = [16, 32], strides = [1, 1]} : vector<96x32xf32> to vector<16x32xf32>
    %66 = arith.addf %64, %65 : vector<16x32xf32>
    %cst_26 = arith.constant 5.000000e-01 : f32
    %67 = vector.broadcast %cst_26 : f32 to vector<16x32xf32>
    %68 = arith.mulf %66, %67 : vector<16x32xf32>
    %69 = vector.extract_strided_slice %51 {offsets = [80, 0], sizes = [16, 32], strides = [1, 1]} : vector<96x32xf32> to vector<16x32xf32>
    %70 = arith.addf %68, %69 : vector<16x32xf32>
    %cst_27 = arith.constant 5.000000e-01 : f32
    %71 = vector.broadcast %cst_27 : f32 to vector<16x32xf32>
    %72 = arith.mulf %70, %71 : vector<16x32xf32>
    %73 = tpu.concatenate %52, %56, %60, %64, %68, %72 in 0 : vector<16x32xf32>, vector<16x32xf32>, vector<16x32xf32>, vector<16x32xf32>, vector<16x32xf32>, vector<16x32xf32> -> vector<96x32xf32>
    %c0_28 = arith.constant 0 : index
    %c0_29 = arith.constant 0 : index
    %74 = vector.load %arg7[%c0_28, %c0_29] : memref<96x32xf32, #tpu.memory_space<vmem>>, vector<96x32xf32>
    tpu.vector_store %arg7[%c0_28, %c0_29], %73 {strides = array<i32>} : memref<96x32xf32, #tpu.memory_space<vmem>>, vector<96x32xf32>,
    return
  }
}

</mosaic_0001>

<bundles_post_ra>
// kernel: tpu_custom_call.1
= control target key start
LH: loop header
LB: loop body
LE: loop exit
PB: predicated region body
PF: predicated region fallthrough
CT: control target
= control target key end

     0   :  { %vm85_vm0 = vcmask 261120   ;;  %s1769_s2 = inlined_call_operand.vmem [shape: f32[32,32], index: 2, kind: input, shape index: {}]   ;;  %s1770_s0 = inlined_call_operand.vmem [shape: f32[96,32], index: 0, kind: input, shape index: {}]   ;;  %s1771_s1 = inlined_call_operand.vmem [shape: f32[96,32], index: 1, kind: input, shape index: {}]   ;;  %s1772_s3 = inlined_call_operand.vmem [shape: f32[1,32], index: 3, kind: input, shape index: {}]   ;;  %s1773_s4 = inlined_call_operand.vmem [shape: f32[32,32], index: 4, kind: input, shape index: {}]   ;;  %s1774_s5 = inlined_call_operand.vmem [shape: f32[32,32], index: 5, kind: input, shape index: {}]   ;;  %s1775_s6 = inlined_call_operand.vmem [shape: f32[3,32], index: 6, kind: input, shape index: {}]   ;;  %s1776_s7 = inlined_call_operand.vmem [shape: f32[96,32], index: 7, kind: output, shape index: {}]  }
   0x1   :  { %v77_v0 = vld [vmem:[%s1769_s2 + $0x18] sm:$0xff]  ;;  %v76_v1 = vld [vmem:[%s1769_s2 + $0x10] sm:$0xff]  ;;  %v75_v2 = vld [vmem:[%s1769_s2 + $0x8] sm:$0xff] }
   0x2   :  { %1036 = vmatprep.subr.mxu0 %v77_v0  ;;  %v26_v3 = vld [vmem:[%s1770_s0] sm:$0xff]  ;;  %1114 = vmatprep.subr.mxu1 %v77_v0  ;;  %v27_v7 = vld [vmem:[%s1770_s0 + $0x8] sm:$0xff]  ;;  %v28_v9 = vld [vmem:[%s1770_s0 + $0x10] sm:$0xff] }
   0x3   :  { %v38_v4 = vld [vmem:[%s1771_s1] sm:$0xff]  ;;  %1037 = vmatpush3.msra.mxu0 %v77_v0  ;;  %v39_v8 = vld [vmem:[%s1771_s1 + $0x8] sm:$0xff]  ;;  %1118 = vmatpush3.msra.mxu1 %v77_v0  ;;  %v40_v11 = vld [vmem:[%s1771_s1 + $0x10] sm:$0xff] }
   0x4   :  { %v74_v5 = vld [vmem:[%s1769_s2] sm:$0xff]  ;;  %v50_v6 = vadd.f32 %v38_v4, %v26_v3  ;;  %1038 = vmatprep.subr.mxu0 %v76_v1  ;;  %v51_v10 = vadd.f32 %v39_v8, %v27_v7  ;;  %v29_v12 = vld [vmem:[%s1770_s0 + $0x18] sm:$0xff]  ;;  %1115 = vmatprep.subr.mxu1 %v76_v1  ;;  %v52_v15 = vadd.f32 %v40_v11, %v28_v9  ;;  %v31_v18 = vld [vmem:[%s1770_s0 + $0x28] sm:$0xff] }
   0x5   :  { %v41_v13 = vld [vmem:[%s1771_s1 + $0x18] sm:$0xff]  ;;  %1039 = vmatpush3.msra.mxu0 %v76_v1  ;;  %1119 = vmatpush3.msra.mxu1 %v76_v1  ;;  %v30_v16 = vld [vmem:[%s1770_s0 + $0x20] sm:$0xff]  ;;  %v43_v21 = vld [vmem:[%s1771_s1 + $0x28] sm:$0xff] }
   0x6   :  { %v1270_v14 = vmul.f32 0.5, %v50_v6  ;;  %v42_v17 = vld [vmem:[%s1771_s1 + $0x20] sm:$0xff]  ;;  %1040 = vmatprep.subr.mxu0 %v75_v2  ;;  %v1281_v19 = vmul.f32 0.5, %v51_v10  ;;  %v53_v20 = vadd.f32 %v41_v13, %v29_v12  ;;  %1116 = vmatprep.subr.mxu1 %v75_v2  ;;  %v32_v22 = vld [vmem:[%s1770_s0 + $0x30] sm:$0xff]  ;;  %v1294_v24 = vmul.f32 0.5, %v52_v15  ;;  %v33_v27 = vld [vmem:[%s1770_s0 + $0x38] sm:$0xff] }
   0x7   :  { %v44_v23 = vld [vmem:[%s1771_s1 + $0x30] sm:$0xff]  ;;  %1041 = vmatpush3.msra.mxu0 %v75_v2  ;;  %v54_v25 = vadd.f32 %v42_v17, %v30_v16  ;;  %v45_v28 = vld [vmem:[%s1771_s1 + $0x38] sm:$0xff]  ;;  %v34_v29 = vld [vmem:[%s1770_s0 + $0x40] sm:$0xff]  ;;  %1120 = vmatpush3.msra.mxu1 %v75_v2  ;;  %v55_v41 = vadd.f32 %v43_v21, %v31_v18 }
   0x8   :  { %1044 = vmatprep.mubr.msk.f32.mxu0 %vm85_vm0, %v1270_v14  ;;  %v56_v26 = vadd.f32 %v44_v23, %v32_v22  ;;  %1042 = vmatprep.subr.mxu0 %v74_v5  ;;  %v57_v30 = vadd.f32 %v45_v28, %v33_v27  ;;  %v46_v31 = vld [vmem:[%s1771_s1 + $0x40] sm:$0xff]  ;;  %v35_v32 = vld [vmem:[%s1770_s0 + $0x48] sm:$0xff]  ;;  %v36_v37 = vld [vmem:[%s1770_s0 + $0x50] sm:$0xff]  ;;  %v1327_v40 = vmul.f32 0.5, %v53_v20 }
   0x9   :  { %v47_v33 = vld [vmem:[%s1771_s1 + $0x48] sm:$0xff]  ;;  %1043 = vmatpush3.msra.mxu0 %v74_v5  ;;  %1117 = vmatprep.subr.mxu1 %v74_v5  ;;  %v58_v35 = vadd.f32 %v46_v31, %v34_v29  ;;  %v48_v38 = vld [vmem:[%s1771_s1 + $0x50] sm:$0xff]  ;;  %v37_v39 = vld [vmem:[%s1770_s0 + $0x58] sm:$0xff]  ;;  %v1336_v45 = vmul.f32 0.5, %v54_v25  ;;  %v1352_v50 = vmul.f32 0.5, %v55_v41 }
   0xa   :  { %v1314_v34 = vmul.f32 0.5, %v56_v26  ;;  %v59_v36 = vadd.f32 %v47_v33, %v35_v32  ;;  %1045 = vmatmul.mubr.msk.f32.vlgmr.msra.gmra.mxu0 %vm85_vm0, %v1281_v19  ;;  %1121 = vmatpush3.msra.mxu1 %v74_v5  ;;  %v1329_v42 = vmul.f32 0.5, %v57_v30  ;;  %v60_v43 = vadd.f32 %v48_v38, %v36_v37  ;;  %v49_v44 = vld [vmem:[%s1771_s1 + $0x58] sm:$0xff]  ;;  %v951_v53 = vld [vmem:[%s1772_s3] ss:$0 sm:$0xff]  ;;  %v321_v29 = vld [vmem:[%s1773_s4 + $0x10] sm:$0xff] }
   0xb   :  { %1047 = vmatprep.mubr.msk.f32.mxu0 %vm85_vm0, %v1294_v24  ;;  %v1340_v46 = vmul.f32 0.5, %v58_v35  ;;  %v61_v48 = vadd.f32 %v49_v44, %v37_v39  ;;  %v322_v28 = vld [vmem:[%s1773_s4 + $0x18] sm:$0xff]  ;;  %v320_v30 = vld [vmem:[%s1773_s4 + $0x8] sm:$0xff]  ;;  %v319_v31 = vld [vmem:[%s1773_s4] sm:$0xff] }
   0xc   :  { %1053 = vmatprep.mubr.msk.f32.mxu1 %vm85_vm0, %v1314_v34  ;;  %v1344_v47 = vmul.f32 0.5, %v59_v36  ;;  %v1348_v49 = vmul.f32 0.5, %v60_v43  ;;  %1062 = vmatprep.subr.mxu1 %v322_v28 }
   0xd   :  { %1054 = vmatmul.mubr.msk.f32.vlgmr.msra.gmra.mxu1 %vm85_vm0, %v1329_v42  ;;  %v1358_v51 = vmul.f32 0.5, %v61_v48 }
   0xe   :  { %1056 = vmatprep.mubr.msk.f32.mxu1 %vm85_vm0, %v1340_v46  ;;  %1048 = vmatmul.mubr.msk.f32.gmra.mxu0 %vm85_vm0, %v1327_v40 }
   0xf   :  { %1050 = vmatprep.mubr.msk.f32.mxu0 %vm85_vm0, %v1336_v45  ;;  %1063 = vmatpush3.msra.mxu1 %v322_v28  ;;  %v524_v28 = vld [vmem:[%s1774_s5 + $0x18] sm:$0xff] }
  0x10   :  { %1064 = vmatprep.subr.mxu1 %v321_v29  ;;  %1088 = vmatprep.subr.mxu0 %v524_v28 }
  0x11   :  { %1057 = vmatmul.mubr.msk.f32.gmra.mxu1 %vm85_vm0, %v1344_v47  ;;  %1089 = vmatpush3.msra.mxu0 %v524_v28 }
  0x12   :  { %1059 = vmatprep.mubr.msk.f32.mxu1 %vm85_vm0, %v1348_v49  ;;  %1051 = vmatmul.mubr.msk.f32.gmra.mxu0 %vm85_vm0, %v1352_v50 }
  0x13   :  { %1065 = vmatpush3.msra.mxu1 %v321_v29  ;;  %v523_v29 = vld [vmem:[%s1774_s5 + $0x10] sm:$0xff] }
  0x14   :  { %1066 = vmatprep.subr.mxu1 %v320_v30  ;;  %1090 = vmatprep.subr.mxu0 %v523_v29 }
  0x15   :  { %1060 = vmatmul.mubr.msk.f32.gmra.mxu1 %vm85_vm0, %v1358_v51  ;;  %1091 = vmatpush3.msra.mxu0 %v523_v29 }
  0x16   :  { %1067 = vmatpush3.msra.mxu1 %v320_v30  ;;  %v522_v30 = vld [vmem:[%s1774_s5 + $0x8] sm:$0xff] }
  0x17   :  { %1068 = vmatprep.subr.mxu1 %v319_v31  ;;  %1092 = vmatprep.subr.mxu0 %v522_v30 }
  0x18   :  { %1069 = vmatpush3.msra.mxu1 %v319_v31  ;;  %1093 = vmatpush3.msra.mxu0 %v522_v30  ;;  %v521_v31 = vld [vmem:[%s1774_s5] sm:$0xff] }
  0x19   :  { %1094 = vmatprep.subr.mxu0 %v521_v31 }
  0x1a   :  { %1095 = vmatpush3.msra.mxu0 %v521_v31 }
  0xca   :  { %v1046_v52 = vpop.f32.mrf.mxu0 }
  0xcb   :  { %v1369_v59 = vadd.f32 %v1046_v52, %v951_v53 }
  0xcc   :  { %v188_v54 = vpop.f32.mrf.mxu0 }
  0xcd   :  { %v1055_v55 = vpop.f32.mrf.mxu1  ;;  %v189_v56 = vadd.f32 %v951_v53, %v188_v54  ;;  %v250_v4 = vsel %vm85_vm0, %v1369_v59, -inf }
  0xce   :  { %v1049_v57 = vpop.f32.mrf.mxu0  ;;  %v1384_v12 = vadd.f32 %v1055_v55, %v951_v53 }
  0xcf   :  { %v218_v58 = vpop.f32.mrf.mxu1  ;;  %v247_v60 = vsel %vm85_vm0, %v189_v56, -inf  ;;  %v1372_v2 = vadd.f32 %v1049_v57, %v951_v53 }
  0xd0   :  { %v198_v61 = vpop.f32.mrf.mxu0  ;;  %248 = vmax.xlane.f32.xlu0 %v247_v60  ;;  %v1379_v8 = vadd.f32 %v951_v53, %v218_v58  ;;  %v268_v21 = vsel %vm85_vm0, %v1384_v12, -inf }
  0xd1   :  { %v1058_v62 = vpop.f32.mrf.mxu1  ;;  %v199_v63 = vadd.f32 %v951_v53, %v198_v61  ;;  %v256_v10 = vsel %vm85_vm0, %v1372_v2, -inf }
  0xd2   :  { %v1052_v0 = vpop.f32.mrf.mxu0  ;;  %v265_v16 = vsel %vm85_vm0, %v1379_v8, -inf  ;;  %v1392_v18 = vadd.f32 %v1058_v62, %v951_v53 }
  0xd3   :  { %v228_v1 = vpop.f32.mrf.mxu1  ;;  %v253_v3 = vsel %vm85_vm0, %v199_v63, -inf  ;;  %v1377_v6 = vadd.f32 %v1052_v0, %v951_v53 }
  0xd4   :  { %v208_v5 = vpop.f32.mrf.mxu0  ;;  %254 = vmax.xlane.f32.xlu1 %v253_v3  ;;  %251 = vmax.xlane.f32.xlu0 %v250_v4  ;;  %v1386_v13 = vadd.f32 %v951_v53, %v228_v1  ;;  %v274_v25 = vsel %vm85_vm0, %v1392_v18, -inf }
  0xd5   :  { %v209_v7 = vadd.f32 %v951_v53, %v208_v5  ;;  %v1061_v9 = vpop.f32.mrf.mxu1  ;;  %v262_v15 = vsel %vm85_vm0, %v1377_v6, -inf }
  0xd6   :  { %v271_v22 = vsel %vm85_vm0, %v1386_v13, -inf  ;;  %v1400_v23 = vadd.f32 %v1061_v9, %v951_v53 }
  0xd7   :  { %v259_v11 = vsel %vm85_vm0, %v209_v7, -inf  ;;  %v238_v17 = vpop.f32.mrf.mxu1 }
  0xd8   :  { %257 = vmax.xlane.f32.xlu1 %v256_v10  ;;  %260 = vmax.xlane.f32.xlu0 %v259_v11  ;;  %v1394_v20 = vadd.f32 %v951_v53, %v238_v17  ;;  %v280_v27 = vsel %vm85_vm0, %v1400_v23, -inf }
  0xda   :  { %v277_v26 = vsel %vm85_vm0, %v1394_v20, -inf }
  0xdc   :  { %263 = vmax.xlane.f32.xlu1 %v262_v15  ;;  %266 = vmax.xlane.f32.xlu0 %v265_v16 }
  0xe0   :  { %269 = vmax.xlane.f32.xlu1 %v268_v21  ;;  %272 = vmax.xlane.f32.xlu0 %v271_v22 }
  0xe4   :  { %275 = vmax.xlane.f32.xlu1 %v274_v25  ;;  %278 = vmax.xlane.f32.xlu0 %v277_v26 }
  0xe8   :  { %281 = vmax.xlane.f32.xlu1 %v280_v27 }
 0x159   :  { %v249_v32 = vpop.xlane.xlu0 %248 }
 0x15a   :  { %v283_v33 = vsub.f32 %v189_v56, %v249_v32 }
 0x15c   :  { %v295_v35 = vmul.f32 1.442695, %v283_v33 }
 0x15d   :  { %v255_v36 = vpop.xlane.xlu1 %254  ;;  %v252_v37 = vpop.xlane.xlu0 %251 }
 0x15e   :  { %1122 = vpow2.f32 %v295_v35  ;;  %v285_v38 = vsub.f32 %v199_v63, %v255_v36  ;;  %v284_v39 = vsub.f32 %v1369_v59, %v252_v37 }
 0x160   :  { %v299_v41 = vmul.f32 1.442695, %v285_v38  ;;  %v297_v43 = vmul.f32 1.442695, %v284_v39 }
 0x161   :  { %v258_v44 = vpop.xlane.xlu1 %257  ;;  %v261_v48 = vpop.xlane.xlu0 %260 }
 0x162   :  { %1124 = vpow2.f32 %v299_v41  ;;  %v286_v52 = vsub.f32 %v1372_v2, %v258_v44  ;;  %v287_v53 = vsub.f32 %v209_v7, %v261_v48 }
 0x163   :  { %1126 = vpow2.f32 %v297_v43 }
 0x164   :  { %v301_v54 = vmul.f32 1.442695, %v286_v52  ;;  %v303_v55 = vmul.f32 1.442695, %v287_v53 }
 0x165   :  { %v264_v57 = vpop.xlane.xlu1 %263  ;;  %v267_v56 = vpop.xlane.xlu0 %266 }
 0x166   :  { %1128 = vpow2.f32 %v301_v54  ;;  %v288_v58 = vsub.f32 %v1377_v6, %v264_v57  ;;  %v289_v60 = vsub.f32 %v1379_v8, %v267_v56 }
 0x167   :  { %1130 = vpow2.f32 %v303_v55 }
 0x168   :  { %v305_v59 = vmul.f32 1.442695, %v288_v58  ;;  %v307_v61 = vmul.f32 1.442695, %v289_v60 }
 0x169   :  { %v270_v62 = vpop.xlane.xlu1 %269  ;;  %v273_v63 = vpop.xlane.xlu0 %272 }
 0x16a   :  { %1132 = vpow2.f32 %v305_v59  ;;  %v290_v0 = vsub.f32 %v1384_v12, %v270_v62  ;;  %v291_v1 = vsub.f32 %v1386_v13, %v273_v63 }
 0x16b   :  { %v1426_v2 = vpop.eup %1122  ;;  %1134 = vpow2.f32 %v307_v61 }
 0x16c   :  { %v309_v3 = vmul.f32 1.442695, %v290_v0  ;;  %v311_v4 = vmul.f32 1.442695, %v291_v1  ;;  %1070 = vmatprep.mubr.msk.f32.mxu1 %vm85_vm0, %v1426_v2 }
 0x16d   :  { %v276_v5 = vpop.xlane.xlu1 %275  ;;  %v279_v6 = vpop.xlane.xlu0 %278 }
 0x16e   :  { %1136 = vpow2.f32 %v309_v3  ;;  %v292_v7 = vsub.f32 %v1392_v18, %v276_v5  ;;  %v293_v8 = vsub.f32 %v1394_v20, %v279_v6 }
 0x16f   :  { %v1432_v9 = vpop.eup %1124  ;;  %1138 = vpow2.f32 %v311_v4 }
 0x170   :  { %v1434_v10 = vpop.eup %1126  ;;  %v313_v11 = vmul.f32 1.442695, %v292_v7  ;;  %v315_v12 = vmul.f32 1.442695, %v293_v8 }
 0x171   :  { %1071 = vmatmul.mubr.msk.f32.vlgmr.msra.gmra.mxu1 %vm85_vm0, %v1434_v10  ;;  %v282_v13 = vpop.xlane.xlu1 %281 }
 0x172   :  { %1140 = vpow2.f32 %v313_v11  ;;  %v294_v15 = vsub.f32 %v1400_v23, %v282_v13  ;;  %1073 = vmatprep.mubr.msk.f32.mxu1 %vm85_vm0, %v1432_v9 }
 0x173   :  { %v1441_v16 = vpop.eup %1128  ;;  %1142 = vpow2.f32 %v315_v12 }
 0x174   :  { %v1443_v17 = vpop.eup %1130  ;;  %v317_v18 = vmul.f32 1.442695, %v294_v15 }
 0x175   :  { %1074 = vmatmul.mubr.msk.f32.gmra.mxu1 %vm85_vm0, %v1441_v16 }
 0x176   :  { %1144 = vpow2.f32 %v317_v18  ;;  %1076 = vmatprep.mubr.msk.f32.mxu1 %vm85_vm0, %v1443_v17 }
 0x177   :  { %v1449_v20 = vpop.eup %1132 }
 0x178   :  { %v1451_v21 = vpop.eup %1134 }
 0x179   :  { %1077 = vmatmul.mubr.msk.f32.gmra.mxu1 %vm85_vm0, %v1449_v20 }
 0x17a   :  { %1079 = vmatprep.mubr.msk.f32.mxu1 %vm85_vm0, %v1451_v21 }
 0x17b   :  { %v1457_v22 = vpop.eup %1136 }
 0x17c   :  { %v1459_v23 = vpop.eup %1138 }
 0x17d   :  { %1080 = vmatmul.mubr.msk.f32.gmra.mxu1 %vm85_vm0, %v1457_v22 }
 0x17e   :  { %1082 = vmatprep.mubr.msk.f32.mxu1 %vm85_vm0, %v1459_v23 }
 0x17f   :  { %v1465_v25 = vpop.eup %1140 }
 0x180   :  { %v1467_v26 = vpop.eup %1142 }
 0x181   :  { %1083 = vmatmul.mubr.msk.f32.gmra.mxu1 %vm85_vm0, %v1465_v25 }
 0x182   :  { %1085 = vmatprep.mubr.msk.f32.mxu1 %vm85_vm0, %v1467_v26 }
 0x183   :  { %v1473_v27 = vpop.eup %1144 }
 0x185   :  { %1086 = vmatmul.mubr.msk.f32.gmra.mxu1 %vm85_vm0, %v1473_v27 }
 0x231   :  { %v1072_v32 = vpop.f32.mrf.mxu1 }
 0x232   :  { %v485_v33 = vmax.f32 %v1072_v32, 1e-30  ;;  %v525_v32 = vlaneseq }
 0x233   :  { %v425_v35 = vpop.f32.mrf.mxu1 }
 0x234   :  { %v484_v36 = vmax.f32 %v425_v35, 1e-30  ;;  %1146 = vrcp.f32 %v485_v33  ;;  %v1513_v33 = vshrl.u32 %v525_v32, 7 }
 0x235   :  { %v1075_v37 = vpop.f32.mrf.mxu1 }
 0x236   :  { %1148 = vrcp.f32 %v484_v36  ;;  %v487_v38 = vmax.f32 %v1075_v37, 1e-30 }
 0x237   :  { %v435_v39 = vpop.f32.mrf.mxu1 }
 0x238   :  { %v486_v41 = vmax.f32 %v435_v39, 1e-30  ;;  %1150 = vrcp.f32 %v487_v38 }
 0x239   :  { %v1078_v43 = vpop.f32.mrf.mxu1 }
 0x23a   :  { %1152 = vrcp.f32 %v486_v41  ;;  %v489_v44 = vmax.f32 %v1078_v43, 1e-30 }
 0x23b   :  { %v445_v48 = vpop.f32.mrf.mxu1 }
 0x23c   :  { %v488_v52 = vmax.f32 %v445_v48, 1e-30  ;;  %1154 = vrcp.f32 %v489_v44 }
 0x23d   :  { %v1081_v53 = vpop.f32.mrf.mxu1 }
 0x23e   :  { %1156 = vrcp.f32 %v488_v52  ;;  %v491_v54 = vmax.f32 %v1081_v53, 1e-30 }
 0x23f   :  { %v455_v55 = vpop.f32.mrf.mxu1 }
 0x240   :  { %v490_v57 = vmax.f32 %v455_v55, 1e-30  ;;  %1158 = vrcp.f32 %v491_v54 }
 0x241   :  { %v1084_v56 = vpop.f32.mrf.mxu1  ;;  %v1147_v58 = vpop.eup %1146 }
 0x242   :  { %1160 = vrcp.f32 %v490_v57  ;;  %v493_v60 = vmax.f32 %v1084_v56, 1e-30  ;;  %v509_v0 = vmul.f32 %v1147_v58, %v1434_v10 }
 0x243   :  { %v1149_v59 = vpop.eup %1148  ;;  %v465_v61 = vpop.f32.mrf.mxu1 }
 0x244   :  { %v492_v62 = vmax.f32 %v465_v61, 1e-30  ;;  %v508_v63 = vmul.f32 %v1149_v59, %v1426_v2  ;;  %1162 = vrcp.f32 %v493_v60 }
 0x245   :  { %v1087_v1 = vpop.f32.mrf.mxu1  ;;  %v1151_v3 = vpop.eup %1150 }
 0x246   :  { %1164 = vrcp.f32 %v492_v62  ;;  %v495_v4 = vmax.f32 %v1087_v1, 1e-30  ;;  %1096 = vmatprep.mubr.msk.f32.mxu0 %vm85_vm0, %v508_v63  ;;  %v511_v11 = vmul.f32 %v1151_v3, %v1441_v16 }
 0x247   :  { %v1153_v5 = vpop.eup %1152  ;;  %v475_v6 = vpop.f32.mrf.mxu1  ;;  %1097 = vmatmul.mubr.msk.f32.vlgmr.msra.gmra.mxu0 %vm85_vm0, %v509_v0 }
 0x248   :  { %v494_v7 = vmax.f32 %v475_v6, 1e-30  ;;  %v510_v8 = vmul.f32 %v1153_v5, %v1432_v9  ;;  %1166 = vrcp.f32 %v495_v4 }
 0x249   :  { %v1155_v2 = vpop.eup %1154 }
 0x24a   :  { %1168 = vrcp.f32 %v494_v7  ;;  %1099 = vmatprep.mubr.msk.f32.mxu0 %vm85_vm0, %v510_v8  ;;  %v513_v13 = vmul.f32 %v1155_v2, %v1449_v20 }
 0x24b   :  { %v1157_v10 = vpop.eup %1156  ;;  %1100 = vmatmul.mubr.msk.f32.gmra.mxu0 %vm85_vm0, %v511_v11 }
 0x24c   :  { %v512_v12 = vmul.f32 %v1157_v10, %v1443_v17 }
 0x24d   :  { %v1159_v15 = vpop.eup %1158 }
 0x24e   :  { %1102 = vmatprep.mubr.msk.f32.mxu0 %vm85_vm0, %v512_v12  ;;  %v515_v16 = vmul.f32 %v1159_v15, %v1457_v22 }
 0x24f   :  { %v1161_v18 = vpop.eup %1160  ;;  %1103 = vmatmul.mubr.msk.f32.gmra.mxu0 %vm85_vm0, %v513_v13 }
 0x250   :  { %v514_v9 = vmul.f32 %v1161_v18, %v1451_v21 }
 0x251   :  { %v1163_v28 = vpop.eup %1162 }
 0x252   :  { %1105 = vmatprep.mubr.msk.f32.mxu0 %vm85_vm0, %v514_v9  ;;  %v517_v20 = vmul.f32 %v1163_v28, %v1465_v25  ;;  %v1519_v25 = vld [vmem:[%s1775_s6] sm:$0x7] }
 0x253   :  { %v1165_v29 = vpop.eup %1164  ;;  %1106 = vmatmul.mubr.msk.f32.gmra.mxu0 %vm85_vm0, %v515_v16 }
 0x254   :  { %v516_v17 = vmul.f32 %v1165_v29, %v1459_v23  ;;  %v527_v23 = vsub.s32 0, %v1513_v33 }
 0x255   :  { %v1167_v30 = vpop.eup %1166 }
 0x256   :  { %1108 = vmatprep.mubr.msk.f32.mxu0 %vm85_vm0, %v516_v17  ;;  %v519_v22 = vmul.f32 %v1167_v30, %v1473_v27  ;;  %v1522_v35 = vrot.slane %v1519_v25, %v527_v23 }
 0x257   :  { %v1169_v31 = vpop.eup %1168  ;;  %1109 = vmatmul.mubr.msk.f32.gmra.mxu0 %vm85_vm0, %v517_v20 }
 0x258   :  { %v518_v21 = vmul.f32 %v1169_v31, %v1467_v26 }
 0x25a   :  { %1111 = vmatprep.mubr.msk.f32.mxu0 %vm85_vm0, %v518_v21 }
 0x25b   :  { %1112 = vmatmul.mubr.msk.f32.gmra.mxu0 %vm85_vm0, %v519_v22 }
 0x307   :  { %v1098_v26 = vpop.f32.mrf.mxu0 }
 0x308   :  { %v637_v27 = vadd.f32 %v1098_v26, %v1522_v35 }
 0x309   :  { %v631_v36 = vpop.f32.mrf.mxu0 }
 0x30a   :  { %v1526_v37 = vadd.f32 %v637_v27, %v1281_v19  ;;  %v632_v38 = vadd.f32 %v631_v36, %v1522_v35 }
 0x30b   :  { %v1101_v39 = vpop.f32.mrf.mxu0 }
 0x30c   :  { %v1530_v41 = vadd.f32 %v632_v38, %v1270_v14  ;;  %v647_v43 = vadd.f32 %v1101_v39, %v1522_v35  ;;  %v705_v44 = vsel %vm85_vm0, %v1526_v37, 0.0  ;;  %v752_v48 = vmul.f32 %v1526_v37, %v1526_v37 }
 0x30d   :  { %706 = vadd.xlane.f32.xlu1 %v705_v44  ;;  %v641_v52 = vpop.f32.mrf.mxu0 }
 0x30e   :  { %v642_v53 = vadd.f32 %v641_v52, %v1522_v35  ;;  %v702_v19 = vsel %vm85_vm0, %v1530_v41, 0.0  ;;  %v751_v14 = vmul.f32 %v1530_v41, %v1530_v41  ;;  %v1543_v55 = vadd.f32 %v647_v43, %v1327_v40 }
 0x30f   :  { %703 = vadd.xlane.f32.xlu0 %v702_v19  ;;  %v1104_v54 = vpop.f32.mrf.mxu0  ;;  %v766_v57 = vsel %vm85_vm0, %v752_v48, 0.0 }
 0x310   :  { %v1547_v56 = vadd.f32 %v642_v53, %v1294_v24  ;;  %v763_v58 = vsel %vm85_vm0, %v751_v14, 0.0  ;;  %v657_v59 = vadd.f32 %v1104_v54, %v1522_v35  ;;  %v711_v61 = vsel %vm85_vm0, %v1543_v55, 0.0 }
 0x311   :  { %767 = vadd.xlane.f32.xlu1 %v766_v57  ;;  %v651_v60 = vpop.f32.mrf.mxu0  ;;  %v754_v62 = vmul.f32 %v1543_v55, %v1543_v55 }
 0x312   :  { %v652_v40 = vadd.f32 %v651_v60, %v1522_v35  ;;  %v708_v63 = vsel %vm85_vm0, %v1547_v56, 0.0  ;;  %v753_v24 = vmul.f32 %v1547_v56, %v1547_v56  ;;  %v1561_v1 = vadd.f32 %v657_v59, %v1352_v50 }
 0x313   :  { %764 = vadd.xlane.f32.xlu0 %v763_v58  ;;  %v1107_v0 = vpop.f32.mrf.mxu0  ;;  %v772_v3 = vsel %vm85_vm0, %v754_v62, 0.0 }
 0x314   :  { %v1565_v4 = vadd.f32 %v652_v40, %v1336_v45  ;;  %v769_v5 = vsel %vm85_vm0, %v753_v24, 0.0  ;;  %v667_v7 = vadd.f32 %v1107_v0, %v1522_v35  ;;  %v717_v8 = vsel %vm85_vm0, %v1561_v1, 0.0 }
 0x315   :  { %712 = vadd.xlane.f32.xlu1 %v711_v61  ;;  %v661_v6 = vpop.f32.mrf.mxu0  ;;  %v756_v11 = vmul.f32 %v1561_v1, %v1561_v1 }
 0x316   :  { %v662_v50 = vadd.f32 %v661_v6, %v1522_v35  ;;  %v714_v2 = vsel %vm85_vm0, %v1565_v4, 0.0  ;;  %v755_v45 = vmul.f32 %v1565_v4, %v1565_v4  ;;  %v1579_v12 = vadd.f32 %v667_v7, %v1329_v42 }
 0x317   :  { %709 = vadd.xlane.f32.xlu0 %v708_v63  ;;  %v1110_v10 = vpop.f32.mrf.mxu0  ;;  %v778_v13 = vsel %vm85_vm0, %v756_v11, 0.0 }
 0x318   :  { %v1583_v15 = vadd.f32 %v662_v50, %v1314_v34  ;;  %v775_v18 = vsel %vm85_vm0, %v755_v45, 0.0  ;;  %v677_v16 = vadd.f32 %v1110_v10, %v1522_v35  ;;  %v723_v28 = vsel %vm85_vm0, %v1579_v12, 0.0 }
 0x319   :  { %773 = vadd.xlane.f32.xlu1 %v772_v3  ;;  %v671_v9 = vpop.f32.mrf.mxu0  ;;  %v758_v29 = vmul.f32 %v1579_v12, %v1579_v12 }
 0x31a   :  { %v672_v42 = vadd.f32 %v671_v9, %v1522_v35  ;;  %v720_v17 = vsel %vm85_vm0, %v1583_v15, 0.0  ;;  %v757_v34 = vmul.f32 %v1583_v15, %v1583_v15  ;;  %v1597_v30 = vadd.f32 %v677_v16, %v1344_v47 }
 0x31b   :  { %770 = vadd.xlane.f32.xlu0 %v769_v5  ;;  %v1113_v20 = vpop.f32.mrf.mxu0  ;;  %v784_v31 = vsel %vm85_vm0, %v758_v29, 0.0 }
 0x31c   :  { %v1601_v21 = vadd.f32 %v672_v42, %v1340_v46  ;;  %v781_v22 = vsel %vm85_vm0, %v757_v34, 0.0  ;;  %v687_v23 = vadd.f32 %v1113_v20, %v1522_v35  ;;  %v729_v26 = vsel %vm85_vm0, %v1597_v30, 0.0 }
 0x31d   :  { %718 = vadd.xlane.f32.xlu1 %v717_v8  ;;  %v681_v32 = vpop.f32.mrf.mxu0  ;;  %v760_v27 = vmul.f32 %v1597_v30, %v1597_v30  ;;  %v885_v42 = vsub.s32 1, %v1513_v33  ;;  %v901_v20 = vsub.s32 2, %v1513_v33 }
 0x31e   :  { %v682_v47 = vadd.f32 %v681_v32, %v1522_v35  ;;  %v726_v36 = vsel %vm85_vm0, %v1601_v21, 0.0  ;;  %v759_v46 = vmul.f32 %v1601_v21, %v1601_v21  ;;  %v1615_v38 = vadd.f32 %v687_v23, %v1358_v51 }
 0x31f   :  { %715 = vadd.xlane.f32.xlu0 %v714_v2  ;;  %v790_v39 = vsel %vm85_vm0, %v760_v27, 0.0 }
 0x320   :  { %v1619_v43 = vadd.f32 %v682_v47, %v1348_v49  ;;  %v787_v44 = vsel %vm85_vm0, %v759_v46, 0.0  ;;  %v735_v35 = vsel %vm85_vm0, %v1615_v38, 0.0  ;;  %v762_v48 = vmul.f32 %v1615_v38, %v1615_v38 }
 0x321   :  { %779 = vadd.xlane.f32.xlu1 %v778_v13 }
 0x322   :  { %v732_v51 = vsel %vm85_vm0, %v1619_v43, 0.0  ;;  %v761_v52 = vmul.f32 %v1619_v43, %v1619_v43  ;;  %v796_v49 = vsel %vm85_vm0, %v762_v48, 0.0 }
 0x323   :  { %776 = vadd.xlane.f32.xlu0 %v775_v18 }
 0x324   :  { %v793_v53 = vsel %vm85_vm0, %v761_v52, 0.0 }
 0x325   :  { %724 = vadd.xlane.f32.xlu1 %v723_v28 }
 0x327   :  { %721 = vadd.xlane.f32.xlu0 %v720_v17 }
 0x329   :  { %785 = vadd.xlane.f32.xlu1 %v784_v31 }
 0x32b   :  { %782 = vadd.xlane.f32.xlu0 %v781_v22 }
 0x32d   :  { %730 = vadd.xlane.f32.xlu1 %v729_v26  ;;  %v1649_v26 = vrot.slane %v1519_v25, %v885_v42 }
 0x32f   :  { %727 = vadd.xlane.f32.xlu0 %v726_v36 }
 0x331   :  { %791 = vadd.xlane.f32.xlu1 %v790_v39 }
 0x333   :  { %788 = vadd.xlane.f32.xlu0 %v787_v44  ;;  %v1655_v44 = vrot.slane %v1519_v25, %v901_v20 }
 0x335   :  { %736 = vadd.xlane.f32.xlu1 %v735_v35 }
 0x337   :  { %733 = vadd.xlane.f32.xlu0 %v732_v51 }
 0x339   :  { %797 = vadd.xlane.f32.xlu1 %v796_v49 }
 0x33b   :  { %794 = vadd.xlane.f32.xlu0 %v793_v53 }
 0x396   :  { %v707_v19 = vpop.xlane.xlu1 %706 }
 0x397   :  { %v740_v54 = vmul.f32 0.03125, %v707_v19 }
 0x398   :  { %v704_v14 = vpop.xlane.xlu0 %703 }
 0x399   :  { %v739_v57 = vmul.f32 0.03125, %v704_v14  ;;  %v812_v60 = vmul.f32 %v740_v54, %v740_v54  ;;  %v836_v47 = vsub.f32 %v1526_v37, %v740_v54 }
 0x39a   :  { %v768_v58 = vpop.xlane.xlu1 %767 }
 0x39b   :  { %v800_v59 = vmul.f32 0.03125, %v768_v58  ;;  %v811_v62 = vmul.f32 %v739_v57, %v739_v57  ;;  %v835_v35 = vsub.f32 %v1530_v41, %v739_v57 }
 0x39c   :  { %v765_v61 = vpop.xlane.xlu0 %764 }
 0x39d   :  { %v824_v40 = vsub.f32 %v800_v59, %v812_v60  ;;  %v799_v63 = vmul.f32 0.03125, %v765_v61 }
 0x39e   :  { %v713_v24 = vpop.xlane.xlu1 %712 }
 0x39f   :  { %v848_v0 = vadd.f32 1e-05, %v824_v40  ;;  %v823_v3 = vsub.f32 %v799_v63, %v811_v62  ;;  %v1632_v5 = vmul.f32 0.03125, %v713_v24 }
 0x3a0   :  { %v710_v6 = vpop.xlane.xlu0 %709 }
 0x3a1   :  { %1170 = vrsqrt.f32 %v848_v0  ;;  %v847_v7 = vadd.f32 1e-05, %v823_v3  ;;  %v1634_v8 = vmul.f32 0.03125, %v710_v6  ;;  %v814_v50 = vmul.f32 %v1632_v5, %v1632_v5 }
 0x3a2   :  { %v774_v11 = vpop.xlane.xlu1 %773  ;;  %v838_v62 = vsub.f32 %v1543_v55, %v1632_v5 }
 0x3a3   :  { %1172 = vrsqrt.f32 %v847_v7  ;;  %v802_v2 = vmul.f32 0.03125, %v774_v11  ;;  %v813_v10 = vmul.f32 %v1634_v8, %v1634_v8  ;;  %v837_v7 = vsub.f32 %v1547_v56, %v1634_v8 }
 0x3a4   :  { %v771_v45 = vpop.xlane.xlu0 %770 }
 0x3a5   :  { %v826_v13 = vsub.f32 %v802_v2, %v814_v50  ;;  %v801_v18 = vmul.f32 0.03125, %v771_v45 }
 0x3a6   :  { %v719_v9 = vpop.xlane.xlu1 %718 }
 0x3a7   :  { %v850_v16 = vadd.f32 1e-05, %v826_v13  ;;  %v825_v28 = vsub.f32 %v801_v18, %v813_v10  ;;  %v1640_v29 = vmul.f32 0.03125, %v719_v9 }
 0x3a8   :  { %v716_v17 = vpop.xlane.xlu0 %715 }
 0x3a9   :  { %1174 = vrsqrt.f32 %v850_v16  ;;  %v849_v34 = vadd.f32 1e-05, %v825_v28  ;;  %v1644_v31 = vmul.f32 0.03125, %v716_v17  ;;  %v816_v32 = vmul.f32 %v1640_v29, %v1640_v29 }
 0x3aa   :  { %v780_v22 = vpop.xlane.xlu1 %779 }
 0x3ab   :  { %1176 = vrsqrt.f32 %v849_v34  ;;  %v804_v23 = vmul.f32 0.03125, %v780_v22  ;;  %v815_v36 = vmul.f32 %v1644_v31, %v1644_v31  ;;  %v840_v34 = vsub.f32 %v1561_v1, %v1640_v29 }
 0x3ac   :  { %v777_v27 = vpop.xlane.xlu0 %776 }
 0x3ad   :  { %v828_v46 = vsub.f32 %v804_v23, %v816_v32  ;;  %v803_v39 = vmul.f32 0.03125, %v777_v27 }
 0x3ae   :  { %v1171_v33 = vpop.eup %1170  ;;  %v725_v48 = vpop.xlane.xlu1 %724 }
 0x3af   :  { %v872_v51 = vmul.f32 %v1171_v33, %v836_v47  ;;  %v852_v52 = vadd.f32 1e-05, %v828_v46  ;;  %v827_v49 = vsub.f32 %v803_v39, %v815_v36  ;;  %v1658_v53 = vmul.f32 0.03125, %v725_v48 }
 0x3b0   :  { %v1173_v19 = vpop.eup %1172  ;;  %v722_v14 = vpop.xlane.xlu0 %721  ;;  %v839_v36 = vsub.f32 %v1565_v4, %v1644_v31 }
 0x3b1   :  { %v888_v37 = vmul.f32 %v1649_v26, %v872_v51  ;;  %v871_v54 = vmul.f32 %v1173_v19, %v835_v35  ;;  %1178 = vrsqrt.f32 %v852_v52  ;;  %v851_v58 = vadd.f32 1e-05, %v827_v49 }
 0x3b2   :  { %v818_v60 = vmul.f32 %v1658_v53, %v1658_v53  ;;  %v1663_v25 = vmul.f32 0.03125, %v722_v14  ;;  %v786_v59 = vpop.xlane.xlu1 %785 }
 0x3b3   :  { %v904_v41 = vadd.f32 %v1655_v44, %v888_v37  ;;  %v887_v57 = vmul.f32 %v1649_v26, %v871_v54  ;;  %1180 = vrsqrt.f32 %v851_v58  ;;  %v806_v61 = vmul.f32 0.03125, %v786_v59 }
 0x3b4   :  { %v783_v40 = vpop.xlane.xlu0 %782  ;;  %v817_v24 = vmul.f32 %v1663_v25, %v1663_v25 }
 0x3b5   :  { %936 = vst.msk [vmem:[%s1776_s7 + $0x8] sm:$0xff] %vm85_vm0, %v904_v41  ;;  %v903_v63 = vadd.f32 %v1655_v44, %v887_v57  ;;  %v830_v0 = vsub.f32 %v806_v61, %v818_v60  ;;  %v805_v3 = vmul.f32 0.03125, %v783_v40  ;;  %v842_v57 = vsub.f32 %v1579_v12, %v1658_v53 }
 0x3b6   :  { %v1175_v6 = vpop.eup %1174  ;;  %v731_v11 = vpop.xlane.xlu1 %730 }
 0x3b7   :  { %935 = vst.msk [vmem:[%s1776_s7] sm:$0xff] %vm85_vm0, %v903_v63  ;;  %v874_v55 = vmul.f32 %v1175_v6, %v838_v62  ;;  %v854_v5 = vadd.f32 1e-05, %v830_v0  ;;  %v829_v50 = vsub.f32 %v805_v3, %v817_v24  ;;  %v1682_v2 = vmul.f32 0.03125, %v731_v11 }
 0x3b8   :  { %v1177_v45 = vpop.eup %1176  ;;  %v728_v10 = vpop.xlane.xlu0 %727  ;;  %v841_v3 = vsub.f32 %v1583_v15, %v1663_v25 }
 0x3b9   :  { %v890_v13 = vmul.f32 %v1649_v26, %v874_v55  ;;  %v873_v18 = vmul.f32 %v1177_v45, %v837_v7  ;;  %1182 = vrsqrt.f32 %v854_v5  ;;  %v853_v9 = vadd.f32 1e-05, %v829_v50 }
 0x3ba   :  { %v820_v56 = vmul.f32 %v1682_v2, %v1682_v2  ;;  %v1687_v8 = vmul.f32 0.03125, %v728_v10  ;;  %v792_v16 = vpop.xlane.xlu1 %791 }
 0x3bb   :  { %v906_v28 = vadd.f32 %v1655_v44, %v890_v13  ;;  %v889_v42 = vmul.f32 %v1649_v26, %v873_v18  ;;  %1184 = vrsqrt.f32 %v853_v9  ;;  %v808_v17 = vmul.f32 0.03125, %v792_v16 }
 0x3bc   :  { %v789_v20 = vpop.xlane.xlu0 %788  ;;  %v819_v46 = vmul.f32 %v1687_v8, %v1687_v8 }
 0x3bd   :  { %v916_v22 = vadd.f32 %v906_v28, %v904_v41  ;;  %v905_v32 = vadd.f32 %v1655_v44, %v889_v42  ;;  %v832_v23 = vsub.f32 %v808_v17, %v820_v56  ;;  %v807_v27 = vmul.f32 0.03125, %v789_v20 }
 0x3be   :  { %v1179_v47 = vpop.eup %1178  ;;  %v737_v39 = vpop.xlane.xlu1 %736  ;;  %v844_v56 = vsub.f32 %v1597_v30, %v1682_v2 }
 0x3bf   :  { %v918_v33 = vmul.f32 0.5, %v916_v22  ;;  %v915_v35 = vadd.f32 %v905_v32, %v903_v63  ;;  %v876_v48 = vmul.f32 %v1179_v47, %v840_v34  ;;  %v856_v51 = vadd.f32 1e-05, %v832_v23 }
 0x3c0   :  { %v1181_v52 = vpop.eup %1180  ;;  %v831_v1 = vsub.f32 %v807_v27, %v819_v46  ;;  %v1698_v29 = vmul.f32 0.03125, %v737_v39  ;;  %v734_v49 = vpop.xlane.xlu0 %733  ;;  %v843_v34 = vsub.f32 %v1601_v21, %v1687_v8 }
 0x3c1   :  { %938 = vst.msk [vmem:[%s1776_s7 + $0x18] sm:$0xff] %vm85_vm0, %v918_v33  ;;  %v917_v19 = vmul.f32 0.5, %v915_v35  ;;  %v892_v4 = vmul.f32 %v1649_v26, %v876_v48  ;;  %v875_v31 = vmul.f32 %v1181_v52, %v839_v36  ;;  %1186 = vrsqrt.f32 %v856_v51 }
 0x3c2   :  { %v855_v14 = vadd.f32 1e-05, %v831_v1  ;;  %v749_v37 = vmul.f32 0.03125, %v734_v49  ;;  %v798_v54 = vpop.xlane.xlu1 %797  ;;  %v822_v59 = vmul.f32 %v1698_v29, %v1698_v29  ;;  %v846_v8 = vsub.f32 %v1615_v38, %v1698_v29 }
 0x3c3   :  { %937 = vst.msk [vmem:[%s1776_s7 + $0x10] sm:$0xff] %vm85_vm0, %v917_v19  ;;  %v908_v58 = vadd.f32 %v1655_v44, %v892_v4  ;;  %v891_v60 = vmul.f32 %v1649_v26, %v875_v31  ;;  %v810_v41 = vmul.f32 0.03125, %v798_v54 }
 0x3c4   :  { %1188 = vrsqrt.f32 %v855_v14  ;;  %v795_v61 = vpop.xlane.xlu0 %794  ;;  %v821_v6 = vmul.f32 %v749_v37, %v749_v37 }
 0x3c5   :  { %v920_v62 = vadd.f32 %v918_v33, %v908_v58  ;;  %v907_v40 = vadd.f32 %v1655_v44, %v891_v60  ;;  %v834_v63 = vsub.f32 %v810_v41, %v822_v59  ;;  %v809_v24 = vmul.f32 0.03125, %v795_v61 }
 0x3c6   :  { %v1183_v0 = vpop.eup %1182  ;;  %v845_v33 = vsub.f32 %v1619_v43, %v749_v37 }
 0x3c7   :  { %v922_v7 = vmul.f32 0.5, %v920_v62  ;;  %v919_v11 = vadd.f32 %v917_v19, %v907_v40  ;;  %v878_v55 = vmul.f32 %v1183_v0, %v842_v57  ;;  %v858_v5 = vadd.f32 1e-05, %v834_v63 }
 0x3c8   :  { %v1185_v50 = vpop.eup %1184  ;;  %v833_v45 = vsub.f32 %v809_v24, %v821_v6 }
 0x3c9   :  { %940 = vst.msk [vmem:[%s1776_s7 + $0x28] sm:$0xff] %vm85_vm0, %v922_v7  ;;  %v921_v12 = vmul.f32 0.5, %v919_v11  ;;  %v894_v53 = vmul.f32 %v1649_v26, %v878_v55  ;;  %v877_v10 = vmul.f32 %v1185_v50, %v841_v3  ;;  %1190 = vrsqrt.f32 %v858_v5 }
 0x3ca   :  { %v857_v13 = vadd.f32 1e-05, %v833_v45 }
 0x3cb   :  { %939 = vst.msk [vmem:[%s1776_s7 + $0x20] sm:$0xff] %vm85_vm0, %v921_v12  ;;  %v910_v15 = vadd.f32 %v1655_v44, %v894_v53  ;;  %v893_v25 = vmul.f32 %v1649_v26, %v877_v10 }
 0x3cc   :  { %1192 = vrsqrt.f32 %v857_v13 }
 0x3cd   :  { %v924_v18 = vadd.f32 %v922_v7, %v910_v15  ;;  %v909_v9 = vadd.f32 %v1655_v44, %v893_v25 }
 0x3ce   :  { %v1187_v16 = vpop.eup %1186 }
 0x3cf   :  { %v926_v28 = vmul.f32 0.5, %v924_v18  ;;  %v923_v42 = vadd.f32 %v921_v12, %v909_v9  ;;  %v880_v17 = vmul.f32 %v1187_v16, %v844_v56 }
 0x3d1   :  { %v1189_v20 = vpop.eup %1188  ;;  %942 = vst.msk [vmem:[%s1776_s7 + $0x38] sm:$0xff] %vm85_vm0, %v926_v28  ;;  %v925_v22 = vmul.f32 0.5, %v923_v42  ;;  %v896_v32 = vmul.f32 %v1649_v26, %v880_v17 }
 0x3d2   :  { %v879_v23 = vmul.f32 %v1189_v20, %v843_v34 }
 0x3d3   :  { %941 = vst.msk [vmem:[%s1776_s7 + $0x30] sm:$0xff] %vm85_vm0, %v925_v22  ;;  %v912_v30 = vadd.f32 %v1655_v44, %v896_v32 }
 0x3d4   :  { %v895_v2 = vmul.f32 %v1649_v26, %v879_v23 }
 0x3d5   :  { %v928_v21 = vadd.f32 %v926_v28, %v912_v30 }
 0x3d6   :  { %v1191_v27 = vpop.eup %1190  ;;  %v911_v47 = vadd.f32 %v1655_v44, %v895_v2 }
 0x3d7   :  { %v930_v36 = vmul.f32 0.5, %v928_v21  ;;  %v882_v46 = vmul.f32 %v1191_v27, %v846_v8 }
 0x3d8   :  { %v927_v39 = vadd.f32 %v925_v22, %v911_v47 }
 0x3d9   :  { %v1193_v35 = vpop.eup %1192  ;;  %944 = vst.msk [vmem:[%s1776_s7 + $0x48] sm:$0xff] %vm85_vm0, %v930_v36  ;;  %v898_v48 = vmul.f32 %v1649_v26, %v882_v46 }
 0x3da   :  { %v929_v51 = vmul.f32 0.5, %v927_v39  ;;  %v881_v52 = vmul.f32 %v1193_v35, %v845_v33 }
 0x3db   :  { %v914_v38 = vadd.f32 %v1655_v44, %v898_v48 }
 0x3dc   :  { %943 = vst.msk [vmem:[%s1776_s7 + $0x40] sm:$0xff] %vm85_vm0, %v929_v51  ;;  %v897_v1 = vmul.f32 %v1649_v26, %v881_v52 }
 0x3dd   :  { %v932_v43 = vadd.f32 %v930_v36, %v914_v38 }
 0x3de   :  { %v913_v29 = vadd.f32 %v1655_v44, %v897_v1 }
 0x3df   :  { %v934_v49 = vmul.f32 0.5, %v932_v43 }
 0x3e0   :  { %v931_v19 = vadd.f32 %v929_v51, %v913_v29 }
 0x3e1   :  { %946 = vst.msk [vmem:[%s1776_s7 + $0x58] sm:$0xff] %vm85_vm0, %v934_v49 }
 0x3e2   :  { %v933_v4 = vmul.f32 0.5, %v931_v19 }
 0x3e4   :  { %945 = vst.msk [vmem:[%s1776_s7 + $0x50] sm:$0xff] %vm85_vm0, %v933_v4 }

</bundles_post_ra>
